<compile_context>
chip_gen: v7x
topology: tpu7x:2x2x1
jax: 0.10.0
libtpu: 0.0.40
codegen_flags: <defaults>
</compile_context>

<pallas_src>
import jax
import jax.numpy as jnp
from jax.experimental import pallas as pl
from jax.experimental.pallas import tpu as pltpu


LAMB2 = 1.0
LANE = 128          # padded width for hidden layers and the output
MAX_TILE_B = 1024   # batch rows per grid step (multiple of 8)


def _round_up(x, m):
    return ((x + m - 1) // m) * m


def _softplus(x):
    # Numerically stable softplus: max(x,0) + log1p(exp(-|x|))
    return jnp.maximum(x, 0.0) + jnp.log1p(jnp.exp(-jnp.abs(x)))


def _evidential_mlp_kernel(x_ref,
                           w1_ref, b1_ref,
                           w2_ref, b2_ref,
                           w3_ref, b3_ref,
                           w4_ref, b4_ref,
                           alpha_ref):
    x = x_ref[...]

    h = jnp.dot(x, w1_ref[...], preferred_element_type=jnp.float32) + b1_ref[...]
    h = jnp.maximum(h, 0.0)

    h = jnp.dot(h, w2_ref[...], preferred_element_type=jnp.float32) + b2_ref[...]
    h = jnp.maximum(h, 0.0)

    h = jnp.dot(h, w3_ref[...], preferred_element_type=jnp.float32) + b3_ref[...]
    h = jnp.maximum(h, 0.0)

    logits = jnp.dot(h, w4_ref[...], preferred_element_type=jnp.float32) + b4_ref[...]

    evidence = _softplus(logits)
    alpha_ref[...] = (evidence + LAMB2).astype(alpha_ref.dtype)


def _pad_to(a, shape):
    pads = [(0, s - d) for d, s in zip(a.shape, shape)]
    return jnp.pad(a, pads)


def evidential_net_forward(x, params, *, tile_b=MAX_TILE_B):
    """MLP + softplus + (+lamb2) in one gridded Pallas kernel.

    x: (B, input_dims) float32
    params: dict of w1..w4 (fan_in, fan_out), b1..b4 (1, fan_out)
    returns alpha: (B, output_dim) float32
    """
    B, in_dim = x.shape
    out_dim = params["w4"].shape[1]
    H = LANE  # padded hidden width

    # --- lane-dense (128-wide) padded weights/biases; zeros keep real cols exact ---
    w1 = _pad_to(params["w1"], (in_dim, H))
    b1 = _pad_to(params["b1"], (1, H))
    w2 = _pad_to(params["w2"], (H, H))
    b2 = _pad_to(params["b2"], (1, H))
    w3 = _pad_to(params["w3"], (H, H))
    b3 = _pad_to(params["b3"], (1, H))
    w4 = _pad_to(params["w4"], (H, LANE))
    b4 = _pad_to(params["b4"], (1, LANE))

    # --- batch tiling (pad B up to a multiple of the tile) ---
    TILE_B = min(tile_b, _round_up(B, 8))
    B_pad = _round_up(B, TILE_B)
    x_pad = jnp.pad(x, ((0, B_pad - B), (0, 0))) if B_pad != B else x
    grid = (B_pad // TILE_B,)

    batch_spec = pl.BlockSpec((TILE_B, in_dim), lambda i: (i, 0))
    out_spec = pl.BlockSpec((TILE_B, LANE), lambda i: (i, 0))

    def const_spec(shape):
        return pl.BlockSpec(shape, lambda i: (0, 0))

    in_specs = [
        batch_spec,
        const_spec((in_dim, H)), const_spec((1, H)),
        const_spec((H, H)), const_spec((1, H)),
        const_spec((H, H)), const_spec((1, H)),
        const_spec((H, LANE)), const_spec((1, LANE)),
    ]

    cost = pl.CostEstimate(
        flops=2 * B_pad * (in_dim * H + H * H + H * H + H * LANE),
        transcendentals=2 * B_pad * LANE,  # exp + log1p in softplus
        bytes_accessed=4 * (B_pad * in_dim + B_pad * LANE
                            + in_dim * H + 3 * H * H + 4 * H),
    )

    fn = pl.pallas_call(
        _evidential_mlp_kernel,
        out_shape=jax.ShapeDtypeStruct((B_pad, LANE), jnp.float32),
        grid=grid,
        in_specs=in_specs,
        out_specs=out_spec,
        compiler_params=pltpu.CompilerParams(
            dimension_semantics=("parallel",)),
        cost_estimate=cost,
    )
    alpha_full = fn(x_pad, w1, b1, w2, b2, w3, b3, w4, b4)
    return alpha_full[:B, :out_dim]


def init_params(key, input_dims, hidden_dims, output_dim):
    """Deterministic init mimicking torch.nn.Linear default (uniform +-1/sqrt(fan_in))."""
    dims = [input_dims] + list(hidden_dims) + [output_dim]
    params = {}
    for i in range(len(dims) - 1):
        fan_in, fan_out = dims[i], dims[i + 1]
        key, kw, kb = jax.random.split(key, 3)
        bound = 1.0 / jnp.sqrt(float(fan_in))
        params[f"w{i+1}"] = jax.random.uniform(
            kw, (fan_in, fan_out), jnp.float32, minval=-bound, maxval=bound)
        params[f"b{i+1}"] = jax.random.uniform(
            kb, (1, fan_out), jnp.float32, minval=-bound, maxval=bound)
    return params


def _reference_forward(x, params):
    """Pure-JAX reference of the module forward (alpha path)."""
    h = x
    for i in range(1, 4):
        h = jnp.maximum(h @ params[f"w{i}"] + params[f"b{i}"], 0.0)
    logits = h @ params["w4"] + params["b4"]
    return jax.nn.softplus(logits) + LAMB2


if __name__ == "__main__":
    key = jax.random.PRNGKey(0)
    k_x, k_p = jax.random.split(key)

    # Small shapes consistent with the 'linear' architecture.
    batch = 8
    input_dims = 32
    hidden_dims = [64, 64, 64]
    output_dim = 10

    x = jax.random.normal(k_x, (batch, input_dims), jnp.float32)
    params = init_params(k_p, input_dims, hidden_dims, output_dim)

    alpha = evidential_net_forward(x, params)
    alpha = jax.block_until_ready(alpha)

    # alpha = softplus(logits) + lamb2 >= lamb2 (= 1.0) everywhere.
    assert alpha.shape == (batch, output_dim)
    assert bool(jnp.all(jnp.isfinite(alpha)))
    assert bool(jnp.all(alpha >= LAMB2 - 1e-6))

    # Numerical check against the pure-JAX reference forward.
    ref = _reference_forward(x, params)
    assert bool(jnp.allclose(alpha, ref, atol=1e-5, rtol=1e-5))

    print("KERNEL_OK")
</pallas_src>

<mosaic_0001>
module attributes {stable_mosaic.version = 11 : i64} {
  func.func @_evidential_mlp_kernel(%arg0: i32, %arg1: memref<8x32xf32, #tpu.memory_space<vmem>>, %arg2: memref<32x128xf32, #tpu.memory_space<vmem>>, %arg3: memref<1x128xf32, #tpu.memory_space<vmem>>, %arg4: memref<128x128xf32, #tpu.memory_space<vmem>>, %arg5: memref<1x128xf32, #tpu.memory_space<vmem>>, %arg6: memref<128x128xf32, #tpu.memory_space<vmem>>, %arg7: memref<1x128xf32, #tpu.memory_space<vmem>>, %arg8: memref<128x128xf32, #tpu.memory_space<vmem>>, %arg9: memref<1x128xf32, #tpu.memory_space<vmem>>, %arg10: memref<8x128xf32, #tpu.memory_space<vmem>>) attributes {dimension_semantics = [#tpu.dimension_semantics<parallel>], iteration_bounds = array<i64: 1>, scalar_prefetch = 0 : i64, scratch_operands = 0 : i64, tpu.core_type = #tpu.core_type<tc>, window_params = [{transform_indices = @transform_0, window_bounds = array<i64: 8, 32>}, {pipeline_mode = #tpu.pipeline_mode<synchronous>, transform_indices = @transform_1, window_bounds = array<i64: 32, 128>}, {pipeline_mode = #tpu.pipeline_mode<synchronous>, transform_indices = @transform_2, window_bounds = array<i64: 1, 128>}, {pipeline_mode = #tpu.pipeline_mode<synchronous>, transform_indices = @transform_3, window_bounds = array<i64: 128, 128>}, {pipeline_mode = #tpu.pipeline_mode<synchronous>, transform_indices = @transform_4, window_bounds = array<i64: 1, 128>}, {pipeline_mode = #tpu.pipeline_mode<synchronous>, transform_indices = @transform_5, window_bounds = array<i64: 128, 128>}, {pipeline_mode = #tpu.pipeline_mode<synchronous>, transform_indices = @transform_6, window_bounds = array<i64: 1, 128>}, {pipeline_mode = #tpu.pipeline_mode<synchronous>, transform_indices = @transform_7, window_bounds = array<i64: 128, 128>}, {pipeline_mode = #tpu.pipeline_mode<synchronous>, transform_indices = @transform_8, window_bounds = array<i64: 1, 128>}, {transform_indices = @transform_9, window_bounds = array<i64: 8, 128>}]} {
    %c0 = arith.constant 0 : index
    %c0_0 = arith.constant 0 : index
    %0 = vector.load %arg1[%c0, %c0_0] : memref<8x32xf32, #tpu.memory_space<vmem>>, vector<8x32xf32>
    %c0_1 = arith.constant 0 : index
    %c0_2 = arith.constant 0 : index
    %1 = vector.load %arg2[%c0_1, %c0_2] : memref<32x128xf32, #tpu.memory_space<vmem>>, vector<32x128xf32>
    %cst = arith.constant dense<0.000000e+00> : vector<8x128xf32>
    %2 = tpu.matmul %0, %1, %cst {dimension_numbers = #tpu.dot_dimension_numbers<[1], [0], [0], [1], [0, 0, 1, 1], [], []>} : vector<8x32xf32>, vector<32x128xf32>, vector<8x128xf32> -> vector<8x128xf32>
    %c0_3 = arith.constant 0 : index
    %c0_4 = arith.constant 0 : index
    %3 = vector.load %arg3[%c0_3, %c0_4] : memref<1x128xf32, #tpu.memory_space<vmem>>, vector<1x128xf32>
    %4 = vector.broadcast %3 : vector<1x128xf32> to vector<8x128xf32>
    %5 = arith.addf %2, %4 : vector<8x128xf32>
    %cst_5 = arith.constant 0.000000e+00 : f32
    %6 = vector.broadcast %cst_5 : f32 to vector<8x128xf32>
    %7 = arith.maximumf %5, %6 : vector<8x128xf32>
    %c0_6 = arith.constant 0 : index
    %c0_7 = arith.constant 0 : index
    %8 = vector.load %arg4[%c0_6, %c0_7] : memref<128x128xf32, #tpu.memory_space<vmem>>, vector<128x128xf32>
    %cst_8 = arith.constant dense<0.000000e+00> : vector<8x128xf32>
    %9 = tpu.matmul %7, %8, %cst_8 {dimension_numbers = #tpu.dot_dimension_numbers<[1], [0], [0], [1], [0, 0, 1, 1], [], []>} : vector<8x128xf32>, vector<128x128xf32>, vector<8x128xf32> -> vector<8x128xf32>
    %c0_9 = arith.constant 0 : index
    %c0_10 = arith.constant 0 : index
    %10 = vector.load %arg5[%c0_9, %c0_10] : memref<1x128xf32, #tpu.memory_space<vmem>>, vector<1x128xf32>
    %11 = vector.broadcast %10 : vector<1x128xf32> to vector<8x128xf32>
    %12 = arith.addf %9, %11 : vector<8x128xf32>
    %cst_11 = arith.constant 0.000000e+00 : f32
    %13 = vector.broadcast %cst_11 : f32 to vector<8x128xf32>
    %14 = arith.maximumf %12, %13 : vector<8x128xf32>
    %c0_12 = arith.constant 0 : index
    %c0_13 = arith.constant 0 : index
    %15 = vector.load %arg6[%c0_12, %c0_13] : memref<128x128xf32, #tpu.memory_space<vmem>>, vector<128x128xf32>
    %cst_14 = arith.constant dense<0.000000e+00> : vector<8x128xf32>
    %16 = tpu.matmul %14, %15, %cst_14 {dimension_numbers = #tpu.dot_dimension_numbers<[1], [0], [0], [1], [0, 0, 1, 1], [], []>} : vector<8x128xf32>, vector<128x128xf32>, vector<8x128xf32> -> vector<8x128xf32>
    %c0_15 = arith.constant 0 : index
    %c0_16 = arith.constant 0 : index
    %17 = vector.load %arg7[%c0_15, %c0_16] : memref<1x128xf32, #tpu.memory_space<vmem>>, vector<1x128xf32>
    %18 = vector.broadcast %17 : vector<1x128xf32> to vector<8x128xf32>
    %19 = arith.addf %16, %18 : vector<8x128xf32>
    %cst_17 = arith.constant 0.000000e+00 : f32
    %20 = vector.broadcast %cst_17 : f32 to vector<8x128xf32>
    %21 = arith.maximumf %19, %20 : vector<8x128xf32>
    %c0_18 = arith.constant 0 : index
    %c0_19 = arith.constant 0 : index
    %22 = vector.load %arg8[%c0_18, %c0_19] : memref<128x128xf32, #tpu.memory_space<vmem>>, vector<128x128xf32>
    %cst_20 = arith.constant dense<0.000000e+00> : vector<8x128xf32>
    %23 = tpu.matmul %21, %22, %cst_20 {dimension_numbers = #tpu.dot_dimension_numbers<[1], [0], [0], [1], [0, 0, 1, 1], [], []>} : vector<8x128xf32>, vector<128x128xf32>, vector<8x128xf32> -> vector<8x128xf32>
    %c0_21 = arith.constant 0 : index
    %c0_22 = arith.constant 0 : index
    %24 = vector.load %arg9[%c0_21, %c0_22] : memref<1x128xf32, #tpu.memory_space<vmem>>, vector<1x128xf32>
    %25 = vector.broadcast %24 : vector<1x128xf32> to vector<8x128xf32>
    %26 = arith.addf %23, %25 : vector<8x128xf32>
    %cst_23 = arith.constant 0.000000e+00 : f32
    %27 = vector.broadcast %cst_23 : f32 to vector<8x128xf32>
    %28 = arith.maximumf %26, %27 : vector<8x128xf32>
    %29 = math.absf %26 : vector<8x128xf32>
    %cst_24 = arith.constant 0.000000e+00 : f32
    %30 = vector.broadcast %cst_24 : f32 to vector<8x128xf32>
    %31 = arith.subf %30, %29 : vector<8x128xf32>
    %32 = math.exp %31 : vector<8x128xf32>
    %33 = math.log1p %32 : vector<8x128xf32>
    %34 = arith.addf %28, %33 : vector<8x128xf32>
    %cst_25 = arith.constant 1.000000e+00 : f32
    %35 = vector.broadcast %cst_25 : f32 to vector<8x128xf32>
    %36 = arith.addf %34, %35 : vector<8x128xf32>
    %c0_26 = arith.constant 0 : index
    %c0_27 = arith.constant 0 : index
    %37 = vector.load %arg10[%c0_26, %c0_27] : memref<8x128xf32, #tpu.memory_space<vmem>>, vector<8x128xf32>
    tpu.vector_store %arg10[%c0_26, %c0_27], %36 {strides = array<i32>} : memref<8x128xf32, #tpu.memory_space<vmem>>, vector<8x128xf32>,
    return
  }
  func.func @transform_0(%arg0: i32) -> (i32, i32) {
    %c0_i32 = arith.constant 0 : i32
    %c0_i32_0 = arith.constant 0 : i32
    return %arg0, %c0_i32 : i32, i32
  }
  func.func @transform_1(%arg0: i32) -> (i32, i32) {
    %c0_i32 = arith.constant 0 : i32
    %c0_i32_0 = arith.constant 0 : i32
    %c0_i32_1 = arith.constant 0 : i32
    return %c0_i32, %c0_i32_0 : i32, i32
  }
  func.func @transform_2(%arg0: i32) -> (i32, i32) {
    %c0_i32 = arith.constant 0 : i32
    %c0_i32_0 = arith.constant 0 : i32
    %c0_i32_1 = arith.constant 0 : i32
    return %c0_i32, %c0_i32_0 : i32, i32
  }
  func.func @transform_3(%arg0: i32) -> (i32, i32) {
    %c0_i32 = arith.constant 0 : i32
    %c0_i32_0 = arith.constant 0 : i32
    %c0_i32_1 = arith.constant 0 : i32
    return %c0_i32, %c0_i32_0 : i32, i32
  }
  func.func @transform_4(%arg0: i32) -> (i32, i32) {
    %c0_i32 = arith.constant 0 : i32
    %c0_i32_0 = arith.constant 0 : i32
    %c0_i32_1 = arith.constant 0 : i32
    return %c0_i32, %c0_i32_0 : i32, i32
  }
  func.func @transform_5(%arg0: i32) -> (i32, i32) {
    %c0_i32 = arith.constant 0 : i32
    %c0_i32_0 = arith.constant 0 : i32
    %c0_i32_1 = arith.constant 0 : i32
    return %c0_i32, %c0_i32_0 : i32, i32
  }
  func.func @transform_6(%arg0: i32) -> (i32, i32) {
    %c0_i32 = arith.constant 0 : i32
    %c0_i32_0 = arith.constant 0 : i32
    %c0_i32_1 = arith.constant 0 : i32
    return %c0_i32, %c0_i32_0 : i32, i32
  }
  func.func @transform_7(%arg0: i32) -> (i32, i32) {
    %c0_i32 = arith.constant 0 : i32
    %c0_i32_0 = arith.constant 0 : i32
    %c0_i32_1 = arith.constant 0 : i32
    return %c0_i32, %c0_i32_0 : i32, i32
  }
  func.func @transform_8(%arg0: i32) -> (i32, i32) {
    %c0_i32 = arith.constant 0 : i32
    %c0_i32_0 = arith.constant 0 : i32
    %c0_i32_1 = arith.constant 0 : i32
    return %c0_i32, %c0_i32_0 : i32, i32
  }
  func.func @transform_9(%arg0: i32) -> (i32, i32) {
    %c0_i32 = arith.constant 0 : i32
    %c0_i32_0 = arith.constant 0 : i32
    return %arg0, %c0_i32 : i32, i32
  }
}

</mosaic_0001>

<bundles_post_ra>
// kernel: tpu_custom_call.1
= control target key start
LH: loop header
LB: loop body
LE: loop exit
PB: predicated region body
PF: predicated region fallthrough
CT: control target
= control target key end

     0   :  { %14 = vsyncpa [#allocation3], 0  ;;  %s1102_s0 = inlined_call_operand.hbm [shape: f32[8,32], index: 0, kind: input, shape index: {}]   ;;  %s1103_s1 = inlined_call_operand.hbm [shape: f32[32,128], index: 1, kind: input, shape index: {}]   ;;  %s1104_s2 = inlined_call_operand.vmem [shape: f32[1,128], index: 2, kind: input, shape index: {}]   ;;  %s1105_s3 = inlined_call_operand.hbm [shape: f32[128,128], index: 3, kind: input, shape index: {}]   ;;  %s1106_s4 = inlined_call_operand.vmem [shape: f32[1,128], index: 4, kind: input, shape index: {}]   ;;  %s1107_s5 = inlined_call_operand.hbm [shape: f32[128,128], index: 5, kind: input, shape index: {}]   ;;  %s1108_s6 = inlined_call_operand.vmem [shape: f32[1,128], index: 6, kind: input, shape index: {}]   ;;  %s1109_s7 = inlined_call_operand.hbm [shape: f32[128,128], index: 7, kind: input, shape index: {}]   ;;  %s1110_s8 = inlined_call_operand.vmem [shape: f32[1,128], index: 8, kind: input, shape index: {}]   ;;  %s1111_s9 = inlined_call_operand.hbm [shape: f32[8,128], index: 9, kind: output, shape index: {}]  }
   0x1   :  { %15 = vsyncpa [#allocation6], 0 }
   0x2   :  { %16 = vsyncpa [#allocation9], 0 }
   0x3   :  { %17 = vsyncpa [#allocation4], 0  ;;  %s911_s30 = smov [#allocation5]   ;;  %s771_s13 = scalar_lea.hbm %s1103_s1, 512 }
   0x4   :  { %s33_s10 = sshll.u32 %s911_s30, 4  ;;  %p772_p0 = scmp.ne.s32.totalorder %s1103_s1, %s771_s13  ;;  %s34_s10 = int_to_ptr.vmem [resolvable:$true] %s33_s10 }
   0x5   :  { %p775_p1 = scmp.lt.u32.totalorder %s771_s13, %s1103_s1 }
   0x7   :  { %p777_p2 = pnand %p775_p1, %p772_p0 }
   0x9   :  { %780 = shalt.err (!%p777_p2)
}
   0xa   :  { %s781_s18 = scalar_lea.vmem %s34_s10, 512  ;;  %p786_p4 = scmp.lt.s32.totalorder %s34_s10, %s34_s10 }
   0xb   :  { %p782_p3 = scmp.ne.s32.totalorder %s34_s10, %s781_s18  ;;  %p787_p5 = scmp.lt.s32.totalorder %s781_s18, %s781_s18 }
   0xd   :  { %p788_p6 = por %p787_p5, %p786_p4 }
   0xf   :  { %p789_p7 = pnand %p788_p6, %p782_p3 }
  0x11   :  { %792 = shalt.err (!%p789_p7)
}
  0x12   :  { %s912_s19 = smov 128   ;;  %s913_s20 = smov 8  }
  0x13   :  { %39 = dma.hbm_to_vmem [thread:$0]  %s1103_s1, 512, %s34_s10, [#allocation6], %s912_s19, %s912_s19, %s913_s20  }
  0x14   :  { %s914_s23 = smov [#allocation8]   ;;  %s915_s25 = smov [#allocation2]  }
  0x15   :  { %s61_s24 = sshll.u32 %s914_s23, 4  ;;  %s24_s26 = sshll.u32 %s915_s25, 4  ;;  %s62_s24 = int_to_ptr.vmem [resolvable:$true] %s61_s24  ;;  %s25_s26 = int_to_ptr.vmem [resolvable:$true] %s24_s26 }
  0x16   :  { %s793_s29 = scalar_lea.hbm %s1107_s5, 2048 }
  0x17   :  { %p794_p8 = scmp.ne.s32.totalorder %s1107_s5, %s793_s29  ;;  %p797_p9 = scmp.lt.u32.totalorder %s793_s29, %s1107_s5 }
  0x19   :  { %p799_p10 = pnand %p797_p9, %p794_p8 }
  0x1b   :  { %802 = shalt.err (!%p799_p10)
}
  0x1c   :  { %s803_s1 = scalar_lea.vmem %s62_s24, 2048  ;;  %p808_p12 = scmp.lt.s32.totalorder %s62_s24, %s62_s24 }
  0x1d   :  { %p804_p11 = scmp.ne.s32.totalorder %s62_s24, %s803_s1  ;;  %p809_p13 = scmp.lt.s32.totalorder %s803_s1, %s803_s1 }
  0x1f   :  { %p810_p0 = por %p809_p13, %p808_p12 }
  0x21   :  { %p811_p1 = pnand %p810_p0, %p804_p11 }
  0x23   :  { %814 = shalt.err (!%p811_p1)
}
  0x24   :  { %67 = dma.hbm_to_vmem [thread:$0]  %s1107_s5, 2048, %s62_s24, [#allocation9], %s912_s19, %s912_s19, %s913_s20  }
  0x25   :  { %s815_s17 = scalar_lea.hbm %s1102_s0, 128 }
  0x26   :  { %p816_p2 = scmp.ne.s32.totalorder %s1102_s0, %s815_s17  ;;  %p819_p3 = scmp.lt.u32.totalorder %s815_s17, %s1102_s0 }
  0x28   :  { %p821_p4 = pnand %p819_p3, %p816_p2 }
  0x2a   :  { %824 = shalt.err (!%p821_p4)
}
  0x2b   :  { %s825_s25 = scalar_lea.vmem %s25_s26, 128  ;;  %p830_p6 = scmp.lt.s32.totalorder %s25_s26, %s25_s26 }
  0x2c   :  { %p826_p5 = scmp.ne.s32.totalorder %s25_s26, %s825_s25  ;;  %p831_p7 = scmp.lt.s32.totalorder %s825_s25, %s825_s25 }
  0x2e   :  { %p832_p8 = por %p831_p7, %p830_p6 }
  0x30   :  { %p833_p9 = pnand %p832_p8, %p826_p5 }
  0x32   :  { %836 = shalt.err (!%p833_p9)
}
  0x33   :  { %27 = dma.hbm_to_vmem [thread:$0]  %s1102_s0, 128, %s25_s26, [#allocation3]  }
  0x34   :  { %s916_s27 = smov [#allocation7]   ;;  %s917_s29 = smov [#allocation10]  }
  0x35   :  { %s47_s28 = sshll.u32 %s916_s27, 4  ;;  %s75_s30 = sshll.u32 %s917_s29, 4  ;;  %s48_s28 = int_to_ptr.vmem [resolvable:$true] %s47_s28  ;;  %s76_s30 = int_to_ptr.vmem [resolvable:$true] %s75_s30 }
  0x36   :  { %s837_s13 = scalar_lea.hbm %s1105_s3, 2048 }
  0x37   :  { %p838_p10 = scmp.ne.s32.totalorder %s1105_s3, %s837_s13  ;;  %p841_p11 = scmp.lt.u32.totalorder %s837_s13, %s1105_s3 }
  0x39   :  { %p843_p12 = pnand %p841_p11, %p838_p10 }
  0x3b   :  { %846 = shalt.err (!%p843_p12)
}
  0x3c   :  { %s847_s0 = scalar_lea.vmem %s48_s28, 2048  ;;  %p852_p0 = scmp.lt.s32.totalorder %s48_s28, %s48_s28 }
  0x3d   :  { %p848_p13 = scmp.ne.s32.totalorder %s48_s28, %s847_s0  ;;  %p853_p1 = scmp.lt.s32.totalorder %s847_s0, %s847_s0 }
  0x3f   :  { %p854_p2 = por %p853_p1, %p852_p0 }
  0x41   :  { %p855_p3 = pnand %p854_p2, %p848_p13 }
  0x43   :  { %858 = shalt.err (!%p855_p3)
}
  0x44   :  { %53 = dma.hbm_to_vmem [thread:$0]  %s1105_s3, 2048, %s48_s28, [#allocation6], %s912_s19, %s912_s19, %s913_s20  }
  0x45   :  { %s859_s21 = scalar_lea.hbm %s1109_s7, 2048 }
  0x46   :  { %p860_p4 = scmp.ne.s32.totalorder %s1109_s7, %s859_s21  ;;  %p863_p5 = scmp.lt.u32.totalorder %s859_s21, %s1109_s7 }
  0x48   :  { %p865_p6 = pnand %p863_p5, %p860_p4 }
  0x4a   :  { %868 = shalt.err (!%p865_p6)
}
  0x4b   :  { %s869_s24 = scalar_lea.vmem %s76_s30, 2048  ;;  %p874_p8 = scmp.lt.s32.totalorder %s76_s30, %s76_s30 }
  0x4c   :  { %p870_p7 = scmp.ne.s32.totalorder %s76_s30, %s869_s24  ;;  %p875_p9 = scmp.lt.s32.totalorder %s869_s24, %s869_s24 }
  0x4e   :  { %p876_p10 = por %p875_p9, %p874_p8 }
  0x50   :  { %p877_p11 = pnand %p876_p10, %p870_p7 }
  0x52   :  { %880 = shalt.err (!%p877_p11)
}
  0x53   :  { %81 = dma.hbm_to_vmem [thread:$0]  %s1109_s7, 2048, %s76_s30, [#allocation9], %s912_s19, %s912_s19, %s913_s20  }
  0x54   :  { %903 = dma.done.wait [#allocation3], 128  }
  0x55   :  { %904 = vsyncadd [#allocation3], 4294967168 }
  0x56   :  { %905 = dma.done.wait [#allocation6], 2560  }
  0x57   :  { %906 = vsyncadd [#allocation6], 4294964736 }
  0x58   :  { %907 = dma.done.wait [#allocation9], 4096  }
  0x59   :  { %908 = vsyncadd [#allocation9], 4294963200  ;;  %v918_v0 = vmov 0.0|0.0   ;;  %vm919_vm0 = vmmov 0   ;;  %v920_v1 = vmov 0.0   ;;  %v100_v2 = vld [vmem:[#allocation5] sm:$0xff] }
  0x5a   :  { %678 = vmatprep.subr.bf16.mxu0 %v918_v0  ;;  %570 = vmatprep.mubr.msk.f32.mxu0 %vm919_vm0, %v920_v1  ;;  %v101_v3 = vld [vmem:[#allocation5 + $0x8] sm:$0xff]  ;;  %v102_v4 = vld [vmem:[#allocation5 + $0x10] sm:$0xff]  ;;  %v103_v6 = vld [vmem:[#allocation5 + $0x18] sm:$0xff]  ;;  %vm111_vm1 = vcmask 261120  }
  0x5b   :  { %684 = vmatprep.subr.bf16.mxu1 %v918_v0  ;;  %605 = vmatprep.mubr.msk.f32.mxu1 %vm919_vm0, %v920_v1  ;;  %v679_v5 = vpack.c.bf16 %v101_v3, %v100_v2  ;;  %v186_v7 = vld [vmem:[#allocation7] sm:$0xff]  ;;  %v187_v8 = vld [vmem:[#allocation7 + $0x8] sm:$0xff]  ;;  %v188_v9 = vld [vmem:[#allocation7 + $0x10] sm:$0xff]  ;;  %v682_v11 = vpack.c.bf16 %v103_v6, %v102_v4 }
  0x5c   :  { %v189_v10 = vld [vmem:[#allocation7 + $0x18] sm:$0xff]  ;;  %v685_v12 = vpack.c.bf16 %v187_v8, %v186_v7  ;;  %v190_v14 = vld [vmem:[#allocation7 + $0x20] sm:$0xff]  ;;  %v191_v15 = vld [vmem:[#allocation7 + $0x28] sm:$0xff] }
  0x5d   :  { %680 = vmatpush3.bf16.msra.mxu0 %v679_v5  ;;  %v688_v13 = vpack.c.bf16 %v189_v10, %v188_v9  ;;  %v99_v16 = vld [vmem:[#allocation2] sm:$0xff]  ;;  %v691_v17 = vpack.c.bf16 %v191_v15, %v190_v14  ;;  %v192_v18 = vld [vmem:[#allocation7 + $0x30] sm:$0xff]  ;;  %v194_v21 = vld [vmem:[#allocation7 + $0x40] sm:$0xff] }
  0x5e   :  { %681 = vmatprep.subr.bf16.mxu0 %v918_v0  ;;  %686 = vmatpush3.bf16.msra.mxu1 %v685_v12  ;;  %v193_v19 = vld [vmem:[#allocation7 + $0x38] sm:$0xff]  ;;  %v195_v22 = vld [vmem:[#allocation7 + $0x48] sm:$0xff]  ;;  %v196_v24 = vld [vmem:[#allocation7 + $0x50] sm:$0xff] }
  0x5f   :  { %687 = vmatprep.subr.bf16.mxu1 %v918_v0  ;;  %v694_v20 = vpack.c.bf16 %v193_v19, %v192_v18  ;;  %v697_v23 = vpack.c.bf16 %v195_v22, %v194_v21  ;;  %v197_v25 = vld [vmem:[#allocation7 + $0x58] sm:$0xff]  ;;  %v198_v27 = vld [vmem:[#allocation7 + $0x60] sm:$0xff]  ;;  %v199_v28 = vld [vmem:[#allocation7 + $0x68] sm:$0xff] }
  0x60   :  { %v700_v26 = vpack.c.bf16 %v197_v25, %v196_v24  ;;  %v703_v29 = vpack.c.bf16 %v199_v28, %v198_v27  ;;  %v200_v30 = vld [vmem:[#allocation7 + $0x70] sm:$0xff]  ;;  %v201_v31 = vld [vmem:[#allocation7 + $0x78] sm:$0xff]  ;;  %v280_v33 = vld [vmem:[#allocation8] sm:$0xff] }
  0x61   :  { %683 = vmatpush3.bf16.msra.mxu0 %v682_v11  ;;  %v706_v32 = vpack.c.bf16 %v201_v31, %v200_v30  ;;  %v281_v34 = vld [vmem:[#allocation8 + $0x8] sm:$0xff]  ;;  %v282_v35 = vld [vmem:[#allocation8 + $0x10] sm:$0xff]  ;;  %v283_v37 = vld [vmem:[#allocation8 + $0x18] sm:$0xff] }
  0x62   :  { %708 = vmatprep.subr.bf16.mxu0 %v918_v0  ;;  %689 = vmatpush3.bf16.msra.mxu1 %v688_v13  ;;  %v709_v36 = vpack.c.bf16 %v281_v34, %v280_v33  ;;  %v712_v38 = vpack.c.bf16 %v283_v37, %v282_v35  ;;  %v284_v39 = vld [vmem:[#allocation8 + $0x20] sm:$0xff]  ;;  %v285_v40 = vld [vmem:[#allocation8 + $0x28] sm:$0xff]  ;;  %v286_v42 = vld [vmem:[#allocation8 + $0x30] sm:$0xff] }
  0x63   :  { %690 = vmatprep.subr.bf16.mxu1 %v918_v0  ;;  %v715_v41 = vpack.c.bf16 %v285_v40, %v284_v39  ;;  %v287_v43 = vld [vmem:[#allocation8 + $0x38] sm:$0xff]  ;;  %v288_v45 = vld [vmem:[#allocation8 + $0x40] sm:$0xff]  ;;  %v289_v46 = vld [vmem:[#allocation8 + $0x48] sm:$0xff] }
  0x64   :  { %571 = vmatmul.mubr.msk.f32.vlgmr.msra.gmra.mrb[0].mxu0 %vm111_vm1, %v99_v16  ;;  %v718_v44 = vpack.c.bf16 %v287_v43, %v286_v42  ;;  %v721_v47 = vpack.c.bf16 %v289_v46, %v288_v45  ;;  %v290_v48 = vld [vmem:[#allocation8 + $0x50] sm:$0xff]  ;;  %v291_v49 = vld [vmem:[#allocation8 + $0x58] sm:$0xff]  ;;  %v292_v51 = vld [vmem:[#allocation8 + $0x60] sm:$0xff] }
  0x65   :  { %640 = vmatprep.mubr.msk.f32.mxu0 %vm919_vm0, %v920_v1  ;;  %710 = vmatpush3.bf16.msra.mxu0 %v709_v36  ;;  %v724_v50 = vpack.c.bf16 %v291_v49, %v290_v48  ;;  %v293_v52 = vld [vmem:[#allocation8 + $0x68] sm:$0xff]  ;;  %v501_v54 = vld [vmem:[%s1104_s2] ss:$0 sm:$0xff]  ;;  %v294_v59 = vld [vmem:[#allocation8 + $0x70] sm:$0xff] }
  0x66   :  { %692 = vmatpush3.bf16.msra.mxu1 %v691_v17  ;;  %711 = vmatprep.subr.bf16.mxu0 %v918_v0  ;;  %v727_v53 = vpack.c.bf16 %v293_v52, %v292_v51  ;;  %v295_v60 = vld [vmem:[#allocation8 + $0x78] sm:$0xff]  ;;  %v374_v62 = vld [vmem:[#allocation10] sm:$0xff]  ;;  %v375_v63 = vld [vmem:[#allocation10 + $0x8] sm:$0xff] }
  0x67   :  { %693 = vmatprep.subr.bf16.mxu1 %v918_v0  ;;  %v730_v61 = vpack.c.bf16 %v295_v60, %v294_v59  ;;  %v376_v2 = vld [vmem:[#allocation10 + $0x10] sm:$0xff]  ;;  %v733_v3 = vpack.c.bf16 %v375_v63, %v374_v62  ;;  %v377_v4 = vld [vmem:[#allocation10 + $0x18] sm:$0xff]  ;;  %v378_v6 = vld [vmem:[#allocation10 + $0x20] sm:$0xff] }
  0x68   :  { %v736_v5 = vpack.c.bf16 %v377_v4, %v376_v2  ;;  %v379_v7 = vld [vmem:[#allocation10 + $0x28] sm:$0xff]  ;;  %v381_v9 = vld [vmem:[#allocation10 + $0x38] sm:$0xff]  ;;  %v382_v11 = vld [vmem:[#allocation10 + $0x40] sm:$0xff] }
  0x69   :  { %713 = vmatpush3.bf16.msra.mxu0 %v712_v38  ;;  %v739_v8 = vpack.c.bf16 %v379_v7, %v378_v6  ;;  %v383_v12 = vld [vmem:[#allocation10 + $0x48] sm:$0xff]  ;;  %v384_v14 = vld [vmem:[#allocation10 + $0x50] sm:$0xff]  ;;  %v385_v15 = vld [vmem:[#allocation10 + $0x58] sm:$0xff] }
  0x6a   :  { %695 = vmatpush3.bf16.msra.mxu1 %v694_v20  ;;  %714 = vmatprep.subr.bf16.mxu0 %v918_v0  ;;  %v745_v13 = vpack.c.bf16 %v383_v12, %v382_v11  ;;  %v748_v16 = vpack.c.bf16 %v385_v15, %v384_v14  ;;  %v386_v17 = vld [vmem:[#allocation10 + $0x60] sm:$0xff]  ;;  %v387_v18 = vld [vmem:[#allocation10 + $0x68] sm:$0xff]  ;;  %v503_v20 = vld [vmem:[%s1106_s4] ss:$0 sm:$0xff] }
  0x6b   :  { %696 = vmatprep.subr.bf16.mxu1 %v918_v0  ;;  %v751_v19 = vpack.c.bf16 %v387_v18, %v386_v17  ;;  %v388_v25 = vld [vmem:[#allocation10 + $0x70] sm:$0xff]  ;;  %v504_v28 = vld [vmem:[%s1108_s6] ss:$0 sm:$0xff]  ;;  %s921_s6 = smov [#allocation11]  }
  0x6d   :  { %716 = vmatpush3.bf16.msra.mxu0 %v715_v41 }
  0x6e   :  { %698 = vmatpush3.bf16.msra.mxu1 %v697_v23  ;;  %717 = vmatprep.subr.bf16.mxu0 %v918_v0 }
  0x6f   :  { %699 = vmatprep.subr.bf16.mxu1 %v918_v0 }
  0x71   :  { %719 = vmatpush3.bf16.msra.mxu0 %v718_v44 }
  0x72   :  { %701 = vmatpush3.bf16.msra.mxu1 %v700_v26  ;;  %720 = vmatprep.subr.bf16.mxu0 %v918_v0  ;;  %v389_v26 = vld [vmem:[#allocation10 + $0x78] sm:$0xff] }
  0x73   :  { %702 = vmatprep.subr.bf16.mxu1 %v918_v0  ;;  %v754_v27 = vpack.c.bf16 %v389_v26, %v388_v25 }
  0x75   :  { %722 = vmatpush3.bf16.msra.mxu0 %v721_v47 }
  0x76   :  { %704 = vmatpush3.bf16.msra.mxu1 %v703_v29  ;;  %723 = vmatprep.subr.bf16.mxu0 %v918_v0 }
  0x77   :  { %705 = vmatprep.subr.bf16.mxu1 %v918_v0 }
  0x79   :  { %725 = vmatpush3.bf16.msra.mxu0 %v724_v50 }
  0x7a   :  { %707 = vmatpush3.bf16.msra.mxu1 %v706_v32  ;;  %726 = vmatprep.subr.bf16.mxu0 %v918_v0  ;;  %v505_v32 = vld [vmem:[%s1110_s8] ss:$0 sm:$0xff]  ;;  %s490_s8 = sshll.u32 %s921_s6, 4  ;;  %s491_s8 = int_to_ptr.vmem [resolvable:$true] %s490_s8 }
  0x7b   :  { %732 = vmatprep.subr.bf16.mxu1 %v918_v0  ;;  %s881_s11 = scalar_lea.vmem %s491_s8, 128  ;;  %p886_p13 = scmp.lt.s32.totalorder %s491_s8, %s491_s8 }
  0x7c   :  { %p882_p12 = scmp.ne.s32.totalorder %s491_s8, %s881_s11  ;;  %p887_p0 = scmp.lt.s32.totalorder %s881_s11, %s881_s11 }
  0x7d   :  { %728 = vmatpush3.bf16.msra.mxu0 %v727_v53 }
  0x7e   :  { %729 = vmatprep.subr.bf16.mxu0 %v918_v0  ;;  %p888_p1 = por %p887_p0, %p886_p13 }
  0x80   :  { %p889_p2 = pnand %p888_p1, %p882_p12 }
  0x81   :  { %731 = vmatpush3.bf16.msra.mxu0 %v730_v61 }
 0x137   :  { %v181_v55 = vpop.f32.mrb[0].mxu0 }
 0x138   :  { %v182_v56 = vadd.f32 %v501_v54, %v181_v55  ;;  %v572_v57 = vpop.f32.mrb[1].mxu0 }
 0x13a   :  { %v185_v58 = vmax.f32 %v182_v56, 0.0 }
 0x13c   :  { %606 = vmatmul.mubr.f32.vlgmr.msra.gmra.mrb[0].mxu1 %v185_v58 }
 0x13d   :  { %675 = vmatprep.mubr.msk.f32.mxu1 %vm919_vm0, %v920_v1  ;;  %734 = vmatpush3.bf16.msra.mxu1 %v733_v3  ;;  %v380_v1 = vld [vmem:[#allocation10 + $0x30] sm:$0xff] }
 0x13e   :  { %735 = vmatprep.subr.bf16.mxu1 %v918_v0  ;;  %v742_v10 = vpack.c.bf16 %v381_v9, %v380_v1 }
 0x141   :  { %737 = vmatpush3.bf16.msra.mxu1 %v736_v5 }
 0x142   :  { %738 = vmatprep.subr.bf16.mxu1 %v918_v0 }
 0x145   :  { %740 = vmatpush3.bf16.msra.mxu1 %v739_v8 }
 0x146   :  { %741 = vmatprep.subr.bf16.mxu1 %v918_v0 }
 0x149   :  { %743 = vmatpush3.bf16.msra.mxu1 %v742_v10 }
 0x14a   :  { %744 = vmatprep.subr.bf16.mxu1 %v918_v0 }
 0x14d   :  { %746 = vmatpush3.bf16.msra.mxu1 %v745_v13 }
 0x14e   :  { %747 = vmatprep.subr.bf16.mxu1 %v918_v0 }
 0x151   :  { %749 = vmatpush3.bf16.msra.mxu1 %v748_v16 }
 0x152   :  { %750 = vmatprep.subr.bf16.mxu1 %v918_v0 }
 0x155   :  { %752 = vmatpush3.bf16.msra.mxu1 %v751_v19 }
 0x156   :  { %753 = vmatprep.subr.bf16.mxu1 %v918_v0 }
 0x159   :  { %755 = vmatpush3.bf16.msra.mxu1 %v754_v27 }
 0x20f   :  { %v275_v21 = vpop.f32.mrb[0].mxu1 }
 0x210   :  { %v276_v22 = vadd.f32 %v503_v20, %v275_v21  ;;  %v607_v23 = vpop.f32.mrb[1].mxu1 }
 0x212   :  { %v279_v24 = vmax.f32 %v276_v22, 0.0 }
 0x214   :  { %641 = vmatmul.mubr.f32.vlgmr.msra.gmra.mrb[2].mxu0 %v279_v24 }
 0x2e7   :  { %v369_v29 = vpop.f32.mrb[2].mxu0 }
 0x2e8   :  { %v370_v30 = vadd.f32 %v504_v28, %v369_v29  ;;  %v642_v0 = vpop.f32.mrb[3].mxu0 }
 0x2ea   :  { %v373_v31 = vmax.f32 %v370_v30, 0.0 }
 0x2ec   :  { %676 = vmatmul.mubr.f32.vlgmr.msra.gmra.mrb[2].mxu1 %v373_v31 }
 0x3bf   :  { %v463_v33 = vpop.f32.mrb[2].mxu1 }
 0x3c0   :  { %v464_v34 = vadd.f32 %v505_v32, %v463_v33  ;;  %v677_v35 = vpop.f32.mrb[3].mxu1 }
 0x3c2   :  { %v468_v36 = vand.u32 2147483647, %v464_v34  ;;  %v467_v47 = vmax.f32 %v464_v34, 0.0 }
 0x3c4   :  { %v469_v37 = vsub.f32 0.0, %v468_v36 }
 0x3c6   :  { %v470_v38 = vmul.f32 1.442695, %v469_v37 }
 0x3c8   :  { %767 = vpow2.f32 %v470_v38 }
 0x3d2   :  { %v768_v39 = vpop.eup %767 }
 0x3d3   :  { %v472_v40 = vadd.f32 1.0, %v768_v39  ;;  %v475_v41 = vmul.f32 -0.5, %v768_v39  ;;  %v478_v43 = vand.u32 2147483647, %v768_v39 }
 0x3d5   :  { %769 = vlog2.f32 %v472_v40  ;;  %v476_v42 = vadd.f32 1.0, %v475_v41  ;;  %vm479_vm2 = vcmp.lt.f32.partialorder %v478_v43, 0.0004427343 }
 0x3d7   :  { %v477_v46 = vmul.f32 %v768_v39, %v476_v42 }
 0x3df   :  { %v770_v44 = vpop.eup %769 }
 0x3e0   :  { %v474_v45 = vmul.f32 0.6931472, %v770_v44 }
 0x3e2   :  { %v480_v48 = vsel %vm479_vm2, %v477_v46, %v474_v45 }
 0x3e3   :  { %v481_v49 = vadd.f32 %v480_v48, %v467_v47 }
 0x3e5   :  { %v482_v50 = vadd.f32 1.0, %v481_v49 }
 0x3e7   :  { %483 = vst [vmem:[#allocation11] sm:$0xff] %v482_v50 }
 0x3e8   :  { %892 = shalt.err (!%p889_p2)
}
 0x3e9   :  { %s893_s1 = scalar_lea.hbm %s1111_s9, 128 }
 0x3ea   :  { %p894_p3 = scmp.ne.s32.totalorder %s1111_s9, %s893_s1  ;;  %p897_p4 = scmp.lt.u32.totalorder %s893_s1, %s1111_s9 }
 0x3ec   :  { %p899_p5 = pnand %p897_p4, %p894_p3 }
 0x3ee   :  { %902 = shalt.err (!%p899_p5)
}
 0x3ef   :  { %493 = dma.vmem_to_hbm [thread:$0]  %s491_s8, 128, %s1111_s9, [#allocation4]  }
 0x3f0   :  { %909 = dma.done.wait [#allocation4], 128  }
 0x3f1   :  { %910 = vsyncadd [#allocation4], 4294967168 }
 0x3f2   :  { %497 = vsyncpa [#allocation3], 1 }
 0x3f3   :  { %498 = vsyncpa [#allocation6], 1 }
 0x3f4   :  { %499 = vsyncpa [#allocation9], 1 }
 0x3f5   :  { %500 = vsyncpa [#allocation4], 1 }

</bundles_post_ra>
